<compile_context>
chip_gen: v7x
topology: tpu7x:2x2x1
jax: 0.10.0
libtpu: 0.0.40
codegen_flags: <defaults>
</compile_context>

<pallas_src>
import numpy as np

import jax
import jax.numpy as jnp
from jax import lax
from jax.experimental import pallas as pl
from jax.experimental.pallas import tpu as pltpu


# ----------------------------------------------------------------------------- model config

RESOLUTION = 16                 # small-shape stand-in for 224 in fix_resolution
IN_CH = 1                       # xray models are single-channel
STEM_CH = 16
GROWTH = 8
BN_SIZE = 4
NUM_DENSE_LAYERS = 2
NUM_CLASSES = 18                # torchxrayvision pathology count

BOTTLENECK = BN_SIZE * GROWTH                   # 32
CMAX = STEM_CH + NUM_DENSE_LAYERS * GROWTH      # 32 : final feature width == kernel channel width
HP = RESOLUTION // 2                            # 8  : post-pool spatial extent
KTAPS = 9                                       # 3x3 conv taps
KPAD = 16                                       # taps padded to 16 for a clean bf16 MXU K dim

# column layout of the packed per-channel parameter table (channels on sublanes)
_COL_N0S, _COL_N0T = 0, 1
_COL_LAYER0 = 2                                  # each dense layer uses 4 cols: n1s, n1t, n2s, n2t
_COL_N5S = _COL_LAYER0 + 4 * NUM_DENSE_LAYERS    # 10
_COL_N5T = _COL_N5S + 1                          # 11
_COL_CLSB = _COL_N5S + 2                         # 12
NBN_COLS = 16

assert BOTTLENECK == CMAX   # kernel carries a single padded channel width everywhere


# ----------------------------------------------------------------------------- fused Pallas kernel

def _make_kernel(m, roll_sign):
    """Whole forward pass in one kernel, channels-on-sublanes / spatial-on-lanes layout.

    m:         spatial length per pool phase (= n_batch * HP * HP lanes; 128 at the toy size).
    roll_sign: +1/-1 so that pltpu.roll(x, (roll_sign*off) % m, axis=1)[..., r] == x[..., r+off].
    """

    def kernel(patches_ref, w0t_ref, bn_ref, c1w_ref, c2w_ref, clsw_ref, avg_ref, out_ref):
        f32, bf16 = jnp.float32, jnp.bfloat16
        bn = bn_ref[...]                                                          # (CMAX, NBN_COLS)

        # ---- stem: conv0 over all 4 pool phases in ONE matmul (N = 4*m lanes), BN0+ReLU epilogue,
        #      then the 2x2 max-pool is a max over the 4 aligned phase lane-slices.
        z = jnp.dot(w0t_ref[...], patches_ref[...], preferred_element_type=f32)   # (CMAX, 4m)
        z = jnp.maximum(z * bn[:, _COL_N0S:_COL_N0S + 1] + bn[:, _COL_N0T:_COL_N0T + 1], 0.0)
        feat = z[:, 0:m]
        for p in range(1, 4):
            feat = jnp.maximum(feat, z[:, p * m:(p + 1) * m])                     # (CMAX, m) f32

        # ---- per-tap (lane offset, boundary mask) pairs for the 3x3 convs; position-only, built
        #      once from a 2D iota (mask also kills roll wrap-around across rows/images).
        lane = lax.broadcasted_iota(jnp.int32, (1, m), 1)
        jj = lane % HP
        ii = (lane // HP) % HP
        taps = []
        for ki in range(3):
            for kj in range(3):
                di, dj = ki - 1, kj - 1
                off = di * HP + dj
                mask = ((ii + di >= 0) & (ii + di < HP) &
                        (jj + dj >= 0) & (jj + dj < HP))
                taps.append((off, mask))

        # ---- dense block: BN1+ReLU -> 1x1 conv -> BN2+ReLU -> 3x3 conv as a roll+mask im2col slab
        #      consumed by ONE K=9*32 matmul. "concat" = add into this layer's pre-embedded slice.
        for l in range(NUM_DENSE_LAYERS):
            c0 = _COL_LAYER0 + 4 * l
            h = jnp.maximum(feat * bn[:, c0:c0 + 1] + bn[:, c0 + 1:c0 + 2], 0.0).astype(bf16)
            b = jnp.dot(c1w_ref[l], h, preferred_element_type=f32)                # (BOTTLENECK, m)
            b = jnp.maximum(b * bn[:, c0 + 2:c0 + 3] + bn[:, c0 + 3:c0 + 4], 0.0)
            parts = []
            for off, mask in taps:
                if off == 0:
                    sh = b
                else:
                    sh = pltpu.roll(b, (roll_sign * off) % m, axis=1)             # XLU lane rotate
                    sh = jnp.where(mask, sh, 0.0)
                parts.append(sh.astype(bf16))
            slab = jnp.concatenate(parts, axis=0)                                 # (9*BOTTLENECK, m)
            feat = feat + jnp.dot(c2w_ref[l], slab, preferred_element_type=f32)   # concat-as-add

        # ---- head: BN5+ReLU -> GAP (tiny matmul) -> classifier -> sigmoid; output is (classes, N).
        fin = jnp.maximum(feat * bn[:, _COL_N5S:_COL_N5S + 1] + bn[:, _COL_N5T:_COL_N5T + 1],
                          0.0).astype(bf16)
        pooled = jnp.dot(fin, avg_ref[...], preferred_element_type=f32)           # (CMAX, n_batch)
        logits = jnp.dot(clsw_ref[...], pooled.astype(bf16),
                         preferred_element_type=f32) + bn[:, _COL_CLSB:_COL_CLSB + 1]
        probs = 1.0 / (1.0 + jnp.exp(-logits))                                    # exact sigmoid
        out_ref[...] = probs[:NUM_CLASSES, :]

    return kernel


def _whole(shape):
    nd = len(shape)
    return pl.BlockSpec(shape, lambda i, _nd=nd: (0,) * _nd)


def _detect_roll_sign():
    """Tiny probe kernel pinning down pltpu.roll's rotation direction.

    Returns s in {+1,-1} such that pltpu.roll(x, (s*off) % n, axis=1)[..., r] == x[..., (r+off) % n].
    """
    def probe(x_ref, o_ref):
        o_ref[...] = pltpu.roll(x_ref[...], 1, axis=1)

    x = jnp.broadcast_to(jnp.arange(128, dtype=jnp.float32), (8, 128))
    y = pl.pallas_call(
        probe,
        out_shape=jax.ShapeDtypeStruct((8, 128), jnp.float32),
        grid=(1,),
        in_specs=[_whole((8, 128))],
        out_specs=_whole((8, 128)),
    )(x)
    # jnp.roll convention (out[r] = in[r - shift]) puts x[...,0] at lane 1 -> need shift = -off.
    return -1 if float(y[0, 1]) == 0.0 else 1


# ----------------------------------------------------------------------------- parameters

def _conv_w(key, kh, kw, cin, cout):
    fan_in = kh * kw * cin
    return jax.random.normal(key, (kh, kw, cin, cout), jnp.float32) * jnp.sqrt(2.0 / fan_in)


def _bn_folded(key, c, eps=1e-5):
    k1, k2, k3, k4 = jax.random.split(key, 4)
    gamma = 0.5 + jax.random.uniform(k1, (c,), jnp.float32)
    beta = 0.1 * jax.random.normal(k2, (c,), jnp.float32)
    mean = 0.1 * jax.random.normal(k3, (c,), jnp.float32)
    var = 0.5 + jax.random.uniform(k4, (c,), jnp.float32)
    scale = gamma / jnp.sqrt(var + eps)
    shift = beta - mean * scale
    return scale, shift


def init_params(key):
    keys = iter(jax.random.split(key, 64))
    p = {"conv0_w": _conv_w(next(keys), 3, 3, IN_CH, STEM_CH),
         "norm0": _bn_folded(next(keys), STEM_CH),
         "dense": []}
    ch = STEM_CH
    for _ in range(NUM_DENSE_LAYERS):
        p["dense"].append({
            "norm1": _bn_folded(next(keys), ch),
            "conv1_w": _conv_w(next(keys), 1, 1, ch, BOTTLENECK),
            "norm2": _bn_folded(next(keys), BOTTLENECK),
            "conv2_w": _conv_w(next(keys), 3, 3, BOTTLENECK, GROWTH),
        })
        ch += GROWTH
    p["norm5"] = _bn_folded(next(keys), ch)
    p["cls_w"] = jax.random.normal(next(keys), (ch, NUM_CLASSES), jnp.float32) * jnp.sqrt(1.0 / ch)
    p["cls_b"] = 0.01 * jax.random.normal(next(keys), (NUM_CLASSES,), jnp.float32)
    return p


def pack_params(p):
    """Fold / zero-pad / transpose weights into the lane-dense kernel layout (MXU operands in bf16)."""
    # stem conv0: (3,3,1,16) -> transposed (CMAX, KPAD); zero rows keep padded channels exactly 0.
    w0t = np.zeros((CMAX, KPAD), np.float32)
    w0t[:STEM_CH, :KTAPS] = np.asarray(p["conv0_w"]).reshape(KTAPS, STEM_CH).T

    # all per-channel scale/shift vectors + classifier bias in ONE (CMAX, NBN_COLS) table.
    bn = np.zeros((CMAX, NBN_COLS), np.float32)
    n0s, n0t = p["norm0"]
    bn[:STEM_CH, _COL_N0S] = np.asarray(n0s)
    bn[:STEM_CH, _COL_N0T] = np.asarray(n0t)

    c1w, c2w = [], []
    cin = STEM_CH
    for l, layer in enumerate(p["dense"]):
        c0 = _COL_LAYER0 + 4 * l
        n1s, n1t = layer["norm1"]
        n2s, n2t = layer["norm2"]
        bn[:cin, c0 + 0] = np.asarray(n1s)
        bn[:cin, c0 + 1] = np.asarray(n1t)
        bn[:BOTTLENECK, c0 + 2] = np.asarray(n2s)
        bn[:BOTTLENECK, c0 + 3] = np.asarray(n2t)

        w1 = np.zeros((BOTTLENECK, CMAX), np.float32)                    # 1x1 conv, transposed
        w1[:, :cin] = np.asarray(layer["conv1_w"]).reshape(cin, BOTTLENECK).T
        c1w.append(w1)

        # 3x3 conv, fused-K layout: rows = output channel embedded in this layer's column slice of
        # the running feature map (so "concat" is a plain add); cols = (tap, cin) matching the slab.
        col0 = STEM_CH + l * GROWTH
        w2 = np.zeros((CMAX, KTAPS * BOTTLENECK), np.float32)
        w2[col0:col0 + GROWTH, :] = (np.asarray(layer["conv2_w"])
                                     .reshape(KTAPS, BOTTLENECK, GROWTH)
                                     .transpose(2, 0, 1)
                                     .reshape(GROWTH, KTAPS * BOTTLENECK))
        c2w.append(w2)
        cin += GROWTH

    n5s, n5t = p["norm5"]
    bn[:, _COL_N5S] = np.asarray(n5s)
    bn[:, _COL_N5T] = np.asarray(n5t)
    bn[:NUM_CLASSES, _COL_CLSB] = np.asarray(p["cls_b"])

    clswT = np.zeros((CMAX, CMAX), np.float32)                           # rows = classes (padded)
    clswT[:NUM_CLASSES, :] = np.asarray(p["cls_w"]).T

    # concat-as-add invariant: channels past a stage's true width must see exactly-zero scale/shift
    # and exactly-zero weight rows so they stay 0 through every ReLU.
    assert not bn[STEM_CH:, _COL_N0S:_COL_N0T + 1].any()
    assert not w0t[STEM_CH:, :].any()

    to = lambda a, dt: jnp.asarray(a, dt)
    return (to(w0t, jnp.bfloat16), to(bn, jnp.float32),
            to(np.stack(c1w), jnp.bfloat16), to(np.stack(c2w), jnp.bfloat16),
            to(clswT, jnp.bfloat16))


def build_avg(n_batch):
    """Global-average-pool matrix, transposed for the lane-dense layout: (M, n_batch), 1/64 exact in bf16."""
    m = n_batch * HP * HP
    avg = np.zeros((m, n_batch), np.float32)
    for n in range(n_batch):
        avg[n * HP * HP:(n + 1) * HP * HP, n] = 1.0 / (HP * HP)
    return jnp.asarray(avg, jnp.bfloat16)


# ----------------------------------------------------------------------------- forward glue

def fix_resolution(x_nchw, resolution):
    # TODO(synk): torchxrayvision warns + bilinearly resizes when the input resolution differs from
    # the model's; inputs here are built at the target resolution so this stays an identity check.
    assert x_nchw.shape[-1] == resolution and x_nchw.shape[-2] == resolution
    return x_nchw


def _stem_phase_patches_t(x_nchw):
    """NCHW 1-channel input -> (KPAD, 4*M) bf16 transposed, phase-stacked 3x3 im2col patches.

    Column p*M + r holds output pixel (2*io+pi, 2*jo+pj) of image n, with p = 2*pi + pj and
    r = (n*HP + io)*HP + jo -- matching the kernel's post-pool lane ordering.
    """
    n_batch = x_nchw.shape[0]
    assert x_nchw.shape[1] == IN_CH == 1
    x = x_nchw[:, 0, :, :].astype(jnp.float32)                               # (N, H, W)
    xp = jnp.pad(x, ((0, 0), (1, 1), (1, 1)))
    cols = jnp.stack([xp[:, ki:ki + RESOLUTION, kj:kj + RESOLUTION]
                      for ki in range(3) for kj in range(3)], axis=-1)       # (N, H, W, 9)
    ph = cols.reshape(n_batch, HP, 2, HP, 2, KTAPS)
    ph = ph.transpose(2, 4, 0, 1, 3, 5).reshape(4, n_batch * HP * HP, KTAPS)  # (4, M, 9)
    pt = ph.transpose(2, 0, 1).reshape(KTAPS, 4 * n_batch * HP * HP)          # (9, 4*M)
    pt = jnp.pad(pt, ((0, KPAD - KTAPS), (0, 0)))
    return pt.astype(jnp.bfloat16)


def densenet_xray_forward(packed, avg_t, roll_sign, x_nchw):
    x_nchw = fix_resolution(x_nchw, RESOLUTION)
    n_batch = x_nchw.shape[0]
    m = n_batch * HP * HP          # spatial lanes; a multiple of 128 keeps all lane slices aligned
    patches_t = _stem_phase_patches_t(x_nchw)
    w0t, bnpack, c1w_all, c2w_all, clswT = packed
    inputs = (patches_t, w0t, bnpack, c1w_all, c2w_all, clswT, avg_t)
    out_t = pl.pallas_call(
        _make_kernel(m, roll_sign),
        out_shape=jax.ShapeDtypeStruct((NUM_CLASSES, n_batch), jnp.float32),
        grid=(1,),
        in_specs=[_whole(a.shape) for a in inputs],
        out_specs=_whole((NUM_CLASSES, n_batch)),
        compiler_params=pltpu.CompilerParams(
            dimension_semantics=("arbitrary",),
            # TODO(synk): at a real 224 resolution, tile M on a "parallel" grid axis (2 TCs on v7x)
            # and budget VMEM per generation (64 MiB on v7x) instead of this whole-array grid=(1,).
            vmem_limit_bytes=32 * 1024 * 1024,
        ),
    )(*inputs)
    # kernel output is lane-dense (classes, batch); transposing outside is a tiny layout-only op.
    return out_t.T


# ----------------------------------------------------------------------------- pure-JAX reference

def reference_forward(p, x_nchw):
    relu = lambda v: jnp.maximum(v, 0.0)
    dn = ("NCHW", "HWIO", "NCHW")
    s0, t0 = p["norm0"]
    z = lax.conv_general_dilated(x_nchw.astype(jnp.float32), p["conv0_w"],
                                 window_strides=(1, 1), padding=((1, 1), (1, 1)),
                                 dimension_numbers=dn)
    z = relu(z * s0[None, :, None, None] + t0[None, :, None, None])
    feat = lax.reduce_window(z, -jnp.inf, lax.max, (1, 1, 2, 2), (1, 1, 2, 2), "VALID")
    for layer in p["dense"]:
        s1, t1 = layer["norm1"]
        h = relu(feat * s1[None, :, None, None] + t1[None, :, None, None])
        b = jnp.einsum("nchw,cd->ndhw", h, layer["conv1_w"][0, 0])
        s2, t2 = layer["norm2"]
        b = relu(b * s2[None, :, None, None] + t2[None, :, None, None])
        new = lax.conv_general_dilated(b, layer["conv2_w"], window_strides=(1, 1),
                                       padding=((1, 1), (1, 1)), dimension_numbers=dn)
        feat = jnp.concatenate([feat, new], axis=1)
    s5, t5 = p["norm5"]
    fin = relu(feat * s5[None, :, None, None] + t5[None, :, None, None])
    pooled = fin.mean(axis=(2, 3))
    logits = pooled @ p["cls_w"] + p["cls_b"]
    return jax.nn.sigmoid(logits)


# ----------------------------------------------------------------------------- main

if __name__ == "__main__":
    key = jax.random.PRNGKey(0)
    pkey, xkey = jax.random.split(key)

    raw_params = init_params(pkey)
    packed = pack_params(raw_params)
    n_batch = 2
    avg_t = build_avg(n_batch)

    # PyTorch-convention NCHW input, small shapes: batch=2, 1 channel, 16x16 "xray".
    x = jax.random.normal(xkey, (n_batch, IN_CH, RESOLUTION, RESOLUTION), jnp.float32)

    roll_sign = _detect_roll_sign()

    fwd = jax.jit(lambda pk, av, xx: densenet_xray_forward(pk, av, roll_sign, xx))
    out = jax.block_until_ready(fwd(packed, avg_t, x))

    assert out.shape == (n_batch, NUM_CLASSES)
    assert bool(jnp.all(jnp.isfinite(out)))
    assert bool(jnp.all((out >= 0.0) & (out <= 1.0)))

    # numerical check against the pure-JAX f32 reference (bf16 MXU operands -> loose tolerance)
    ref = reference_forward(raw_params, x)
    max_err = float(jnp.max(jnp.abs(out - ref)))
    assert max_err < 2.5e-2, f"max |kernel - reference| = {max_err}"

    print("KERNEL_OK")
</pallas_src>

<mosaic_0001>
module attributes {stable_mosaic.version = 11 : i64} {
  func.func @probe(%arg0: i32, %arg1: memref<8x128xf32, #tpu.memory_space<vmem>>, %arg2: memref<8x128xf32, #tpu.memory_space<vmem>>) attributes {dimension_semantics = [#tpu.dimension_semantics<arbitrary>], iteration_bounds = array<i64: 1>, scalar_prefetch = 0 : i64, scratch_operands = 0 : i64, tpu.core_type = #tpu.core_type<tc>, window_params = [{pipeline_mode = #tpu.pipeline_mode<synchronous>, transform_indices = @transform_0, window_bounds = array<i64: 8, 128>}, {pipeline_mode = #tpu.pipeline_mode<synchronous>, transform_indices = @transform_1, window_bounds = array<i64: 8, 128>}]} {
    %c0 = arith.constant 0 : index
    %c0_0 = arith.constant 0 : index
    %0 = vector.load %arg1[%c0, %c0_0] : memref<8x128xf32, #tpu.memory_space<vmem>>, vector<8x128xf32>
    %c1_i32 = arith.constant 1 : i32
    %1 = tpu.dynamic_rotate %0 by %c1_i32 dim 1 : vector<8x128xf32>, i32 -> vector<8x128xf32>
    %c0_1 = arith.constant 0 : index
    %c0_2 = arith.constant 0 : index
    %2 = vector.load %arg2[%c0_1, %c0_2] : memref<8x128xf32, #tpu.memory_space<vmem>>, vector<8x128xf32>
    tpu.vector_store %arg2[%c0_1, %c0_2], %1 {strides = array<i32>} : memref<8x128xf32, #tpu.memory_space<vmem>>, vector<8x128xf32>,
    return
  }
  func.func @transform_0(%arg0: i32) -> (i32, i32) {
    %c0_i32 = arith.constant 0 : i32
    %c0_i32_0 = arith.constant 0 : i32
    %c0_i32_1 = arith.constant 0 : i32
    return %c0_i32, %c0_i32_0 : i32, i32
  }
  func.func @transform_1(%arg0: i32) -> (i32, i32) {
    %c0_i32 = arith.constant 0 : i32
    %c0_i32_0 = arith.constant 0 : i32
    %c0_i32_1 = arith.constant 0 : i32
    return %c0_i32, %c0_i32_0 : i32, i32
  }
}

</mosaic_0001>

<bundles_post_ra>
// kernel: tpu_custom_call.1
= control target key start
LH: loop header
LB: loop body
LE: loop exit
PB: predicated region body
PF: predicated region fallthrough
CT: control target
= control target key end

     0   :  { %6 = vsyncpa [#allocation3], 0  ;;  %s128_s0 = inlined_call_operand.hbm [shape: f32[8,128], index: 0, kind: input, shape index: {}]   ;;  %s129_s1 = inlined_call_operand.hbm [shape: f32[8,128], index: 1, kind: output, shape index: {}]  }
   0x1   :  { %7 = vsyncpa [#allocation4], 0  ;;  %s91_s6 = smov [#allocation2]   ;;  %s43_s10 = scalar_lea.hbm %s128_s0, 128 }
   0x2   :  { %s14_s7 = sshll.u32 %s91_s6, 4  ;;  %p44_p0 = scmp.ne.s32.totalorder %s128_s0, %s43_s10  ;;  %s15_s7 = int_to_ptr.vmem [resolvable:$true] %s14_s7 }
   0x3   :  { %p47_p1 = scmp.lt.u32.totalorder %s43_s10, %s128_s0 }
   0x5   :  { %p49_p2 = pnand %p47_p1, %p44_p0 }
   0x7   :  { %52 = shalt.err (!%p49_p2)
}
   0x8   :  { %s53_s15 = scalar_lea.vmem %s15_s7, 128  ;;  %p58_p4 = scmp.lt.s32.totalorder %s15_s7, %s15_s7 }
   0x9   :  { %p54_p3 = scmp.ne.s32.totalorder %s15_s7, %s53_s15  ;;  %p59_p5 = scmp.lt.s32.totalorder %s53_s15, %s53_s15 }
   0xb   :  { %p60_p6 = por %p59_p5, %p58_p4 }
   0xd   :  { %p61_p7 = pnand %p60_p6, %p54_p3 }
   0xf   :  { %64 = shalt.err (!%p61_p7)
}
  0x10   :  { %17 = dma.hbm_to_vmem [thread:$0]  %s128_s0, 128, %s15_s7, [#allocation3]  }
  0x11   :  { %87 = dma.done.wait [#allocation3], 128  }
  0x12   :  { %88 = vsyncadd [#allocation3], 4294967168  ;;  %v21_v0 = vld [vmem:[#allocation2] sm:$0xff]  ;;  %s92_s18 = smov 1   ;;  %s93_s19 = smov [#allocation5]  }
  0x13   :  { %22 = vrot.lane.b32.xlu0 %v21_v0, %s92_s18  ;;  %s31_s20 = sshll.u32 %s93_s19, 4  ;;  %s32_s20 = int_to_ptr.vmem [resolvable:$true] %s31_s20 }
  0x14   :  { %s65_s21 = scalar_lea.vmem %s32_s20, 128  ;;  %p70_p9 = scmp.lt.s32.totalorder %s32_s20, %s32_s20 }
  0x15   :  { %p66_p8 = scmp.ne.s32.totalorder %s32_s20, %s65_s21  ;;  %p71_p10 = scmp.lt.s32.totalorder %s65_s21, %s65_s21 }
  0x17   :  { %p72_p11 = por %p71_p10, %p70_p9 }
  0x19   :  { %p73_p12 = pnand %p72_p11, %p66_p8 }
  0x85   :  { %v23_v1 = vpop.permute.xlu0 %22 }
  0x86   :  { %24 = vst [vmem:[#allocation5] sm:$0xff] %v23_v1 }
  0x87   :  { %76 = shalt.err (!%p73_p12)
}
  0x88   :  { %s77_s0 = scalar_lea.hbm %s129_s1, 128 }
  0x89   :  { %p78_p13 = scmp.ne.s32.totalorder %s129_s1, %s77_s0  ;;  %p81_p0 = scmp.lt.u32.totalorder %s77_s0, %s129_s1 }
  0x8b   :  { %p83_p1 = pnand %p81_p0, %p78_p13 }
  0x8d   :  { %86 = shalt.err (!%p83_p1)
}
  0x8e   :  { %34 = dma.vmem_to_hbm [thread:$0]  %s32_s20, 128, %s129_s1, [#allocation4]  }
  0x8f   :  { %89 = dma.done.wait [#allocation4], 128  }
  0x90   :  { %90 = vsyncadd [#allocation4], 4294967168 }
  0x91   :  { %38 = vsyncpa [#allocation3], 1 }
  0x92   :  { %39 = vsyncpa [#allocation4], 1 }

</bundles_post_ra>
